<compile_context>
chip_gen: v6e
topology: v6e:2x2x1
jax: 0.10.0
libtpu: 0.0.40
codegen_flags: <defaults>
</compile_context>

<pallas_src>
import functools

import jax
import jax.numpy as jnp
from jax.experimental import pallas as pl
from jax.experimental.pallas import tpu as pltpu


# ----------------------------- kernel body ---------------------------------


def _sdpa_kernel(q_ref, k_ref, v_ref, out_ref, attn_ref, *, temperature):
    # Blocks: q (TB, TQ, D), k (TB, Lk, D), v (TB, Lk, Dv)
    inv_temp = 1.0 / temperature
    # Scale q (TQ*D elements) rather than the (TQ*Lk) score matrix.
    q = q_ref[...] * inv_temp
    k = k_ref[...]
    v = v_ref[...]

    # scores = (q/temperature) @ k^T per batch element, f32 MXU accumulation.
    scores = jnp.einsum(
        "bqd,bkd->bqk", q, k, preferred_element_type=jnp.float32
    )  # (TB, TQ, Lk)

    # Numerically stable softmax over the key axis (== torch Softmax(dim=2)).
    # Exact division: `attn` is a user-visible output, so no approx reciprocal.
    m = jnp.max(scores, axis=-1, keepdims=True)
    e = jnp.exp(scores - m)
    s = jnp.sum(e, axis=-1, keepdims=True)
    attn = e / s  # (TB, TQ, Lk), f32

    # output = attn @ v  (attn cast to v's dtype; no-op for f32 inputs).
    out = jnp.einsum(
        "bqk,bkd->bqd", attn.astype(v.dtype), v, preferred_element_type=jnp.float32
    )  # (TB, TQ, Dv)

    attn_ref[...] = attn.astype(attn_ref.dtype)
    out_ref[...] = out.astype(out_ref.dtype)


# --------------------------- budgets & tiles ---------------------------------


def _vmem_budgets():
    """Returns (vmem_limit_bytes, block_budget_bytes, min_grid_steps)."""
    mib = 1024 * 1024
    try:
        cap = pltpu.get_tpu_info().vmem_capacity_bytes
    except Exception:
        cap = 64 * mib  # unknown -> assume the smallest (v7x-like) part
    if cap >= 96 * mib:
        # v5e / v6e: 128 MiB physical, single TensorCore -> no grid-split need.
        return 100 * mib, 80 * mib, 1
    # v7x-like: 64 MiB physical, 2 TensorCores -> want >= 2 parallel grid steps.
    return 48 * mib, 36 * mib, 2


def _divisors_desc(n):
    return sorted({d for d in range(1, n + 1) if n % d == 0}, reverse=True)


def _block_bytes(tb, tq, lk, d, dv, in_itemsize, out_itemsize):
    # q/out/attn tiles move with the grid (double-buffered by the pipeline);
    # k/v blocks are resident across the q-axis but still double-buffered.
    moving = tb * tq * (d * in_itemsize + dv * out_itemsize + lk * out_itemsize)
    resident = tb * lk * (d + dv) * in_itemsize
    # f32 intermediates: scores, exp/attn, and the cast copy for the second
    # matmul are live roughly simultaneously (~2.5x Lk-sized) plus the f32 out.
    compute = int(tb * tq * (2.5 * lk + dv) * 4)
    return 2 * (moving + resident) + compute


def _choose_tiles(b, lq, lk, d, dv, in_itemsize, out_itemsize, budget, min_grid_steps):
    # TQ must be a multiple of 8 (sublane tiling) or the full Lq extent.
    tq_candidates = [t for t in _divisors_desc(lq) if t == lq or t % 8 == 0]
    tb_candidates = _divisors_desc(b)

    fitting = []
    for tq in tq_candidates:
        for tb in tb_candidates:
            if _block_bytes(tb, tq, lk, d, dv, in_itemsize, out_itemsize) <= budget:
                fitting.append((tq, tb))

    if not fitting:
        # TODO(synk): add an Lk-tiled online-softmax path for very long contexts;
        # fall back to the smallest tile (compiler vmem limit still guards OOM).
        return 1, tq_candidates[-1]

    def grid_steps(tq, tb):
        return (b // tb) * (lq // tq)

    # Prefer combos that keep enough grid steps for all TensorCores, then the
    # largest query tile (MXU M dimension), then the largest batch fold.
    preferred = [x for x in fitting if grid_steps(*x) >= min_grid_steps]
    pool = preferred if preferred else fitting
    pool.sort(key=lambda x: (x[0], x[1]), reverse=True)
    tq, tb = pool[0]
    return tb, tq


# ------------------------------- wrapper ------------------------------------


def scaled_dot_product_attention(q, k, v, temperature):
    """Pallas implementation of ScaledDotProductAttention.forward (mask=None, eval)."""
    B, Lq, D = q.shape
    Bk, Lk, Dk = k.shape
    Bv, Lkv, Dv = v.shape
    assert B == Bk == Bv and D == Dk and Lk == Lkv

    vmem_limit, block_budget, min_grid_steps = _vmem_budgets()

    in_itemsize = jnp.dtype(q.dtype).itemsize
    out_itemsize = in_itemsize  # outputs are emitted in the input dtype
    TB, TQ = _choose_tiles(
        B, Lq, Lk, D, Dv, in_itemsize, out_itemsize, block_budget, min_grid_steps
    )

    kernel = functools.partial(_sdpa_kernel, temperature=float(temperature))

    out_shapes = (
        jax.ShapeDtypeStruct((B, Lq, Dv), q.dtype),   # output
        jax.ShapeDtypeStruct((B, Lq, Lk), q.dtype),   # attn
    )

    grid = (B // TB, Lq // TQ)

    grid_spec = pltpu.PrefetchScalarGridSpec(
        num_scalar_prefetch=0,
        grid=grid,
        in_specs=[
            pl.BlockSpec((TB, TQ, D), lambda b, qi: (b, qi, 0)),
            # k/v: constant block index along the q-axis -> stay resident in VMEM.
            pl.BlockSpec((TB, Lk, D), lambda b, qi: (b, 0, 0)),
            pl.BlockSpec((TB, Lk, Dv), lambda b, qi: (b, 0, 0)),
        ],
        out_specs=[
            pl.BlockSpec((TB, TQ, Dv), lambda b, qi: (b, qi, 0)),
            pl.BlockSpec((TB, TQ, Lk), lambda b, qi: (b, qi, 0)),
        ],
    )

    return pl.pallas_call(
        kernel,
        out_shape=out_shapes,
        grid_spec=grid_spec,
        compiler_params=pltpu.CompilerParams(
            dimension_semantics=("parallel", "parallel"),
            vmem_limit_bytes=vmem_limit,
        ),
    )(q, k, v)


# ------------------------------- reference ----------------------------------


def _reference(q, k, v, temperature):
    attn = jnp.einsum("bqd,bkd->bqk", q, k) / temperature
    attn = jax.nn.softmax(attn, axis=2)
    out = jnp.einsum("bqk,bkd->bqd", attn, v)
    return out, attn


if __name__ == "__main__":
    # Small shapes consistent with the module's forward: batch=2, seq=8, hidden=32.
    B, Lq, Lk, D, Dv = 2, 8, 8, 32, 32
    temperature = float(jnp.sqrt(jnp.float32(D)))

    key = jax.random.PRNGKey(0)
    kq, kk, kv = jax.random.split(key, 3)
    q = jax.random.normal(kq, (B, Lq, D), dtype=jnp.float32)
    k = jax.random.normal(kk, (B, Lk, D), dtype=jnp.float32)
    v = jax.random.normal(kv, (B, Lk, Dv), dtype=jnp.float32)

    out, attn = scaled_dot_product_attention(q, k, v, temperature)
    out = jax.block_until_ready(out)
    attn = jax.block_until_ready(attn)

    out_ref, attn_ref = _reference(q, k, v, temperature)
    assert jnp.allclose(out, out_ref, atol=1e-3, rtol=1e-3), "output mismatch"
    assert jnp.allclose(attn, attn_ref, atol=1e-3, rtol=1e-3), "attn mismatch"

    print("KERNEL_OK")
</pallas_src>

<mosaic_0001>
module attributes {stable_mosaic.version = 11 : i64} {
  func.func @_sdpa_kernel(%arg0: i32, %arg1: i32, %arg2: memref<1x8x32xf32, #tpu.memory_space<vmem>>, %arg3: memref<1x8x32xf32, #tpu.memory_space<vmem>>, %arg4: memref<1x8x32xf32, #tpu.memory_space<vmem>>, %arg5: memref<1x8x32xf32, #tpu.memory_space<vmem>>, %arg6: memref<1x8x8xf32, #tpu.memory_space<vmem>>) attributes {dimension_semantics = [#tpu.dimension_semantics<parallel>, #tpu.dimension_semantics<parallel>], iteration_bounds = array<i64: 2, 1>, scalar_prefetch = 0 : i64, scratch_operands = 0 : i64, tpu.core_type = #tpu.core_type<tc>, window_params = [{transform_indices = @transform_0, window_bounds = array<i64: 1, 8, 32>}, {transform_indices = @transform_1, window_bounds = array<i64: 1, 8, 32>}, {transform_indices = @transform_2, window_bounds = array<i64: 1, 8, 32>}, {transform_indices = @transform_3, window_bounds = array<i64: 1, 8, 32>}, {transform_indices = @transform_4, window_bounds = array<i64: 1, 8, 8>}]} {
    %c0 = arith.constant 0 : index
    %c0_0 = arith.constant 0 : index
    %c0_1 = arith.constant 0 : index
    %0 = vector.load %arg2[%c0, %c0_0, %c0_1] : memref<1x8x32xf32, #tpu.memory_space<vmem>>, vector<1x8x32xf32>
    %cst = arith.constant 0.176776692 : f32
    %1 = vector.broadcast %cst : f32 to vector<1x8x32xf32>
    %2 = arith.mulf %0, %1 : vector<1x8x32xf32>
    %c0_2 = arith.constant 0 : index
    %c0_3 = arith.constant 0 : index
    %c0_4 = arith.constant 0 : index
    %3 = vector.load %arg3[%c0_2, %c0_3, %c0_4] : memref<1x8x32xf32, #tpu.memory_space<vmem>>, vector<1x8x32xf32>
    %c0_5 = arith.constant 0 : index
    %c0_6 = arith.constant 0 : index
    %c0_7 = arith.constant 0 : index
    %4 = vector.load %arg4[%c0_5, %c0_6, %c0_7] : memref<1x8x32xf32, #tpu.memory_space<vmem>>, vector<1x8x32xf32>
    "tpu.trace_start"() <{level = 10 : i32, message = "bqd,bkd->bqk"}> : () -> ()
    %cst_8 = arith.constant dense<0.000000e+00> : vector<1x8x8xf32>
    %5 = tpu.matmul %2, %3, %cst_8 {dimension_numbers = #tpu.dot_dimension_numbers<[2], [2], [1], [1], [0, 0, 0, 1, 1, 1], [0], [0]>} : vector<1x8x32xf32>, vector<1x8x32xf32>, vector<1x8x8xf32> -> vector<1x8x8xf32>
    "tpu.trace_stop"() : () -> ()
    %cst_9 = arith.constant dense<0xFF800000> : vector<1x8xf32>
    %6 = vector.multi_reduction <maximumf>, %5, %cst_9 [2] : vector<1x8x8xf32> to vector<1x8xf32>
    %7 = vector.shape_cast %6 : vector<1x8xf32> to vector<1x8x1xf32>
    %8 = vector.broadcast %7 : vector<1x8x1xf32> to vector<1x8x8xf32>
    %9 = arith.subf %5, %8 : vector<1x8x8xf32>
    %10 = math.exp %9 : vector<1x8x8xf32>
    %cst_10 = arith.constant dense<0.000000e+00> : vector<1x8xf32>
    %11 = vector.multi_reduction <add>, %10, %cst_10 [2] : vector<1x8x8xf32> to vector<1x8xf32>
    %12 = vector.shape_cast %11 : vector<1x8xf32> to vector<1x8x1xf32>
    %13 = vector.broadcast %12 : vector<1x8x1xf32> to vector<1x8x8xf32>
    %14 = arith.divf %10, %13 : vector<1x8x8xf32>
    "tpu.trace_start"() <{level = 10 : i32, message = "bqk,bkd->bqd"}> : () -> ()
    %cst_11 = arith.constant dense<0.000000e+00> : vector<1x8x32xf32>
    %15 = tpu.matmul %14, %4, %cst_11 {dimension_numbers = #tpu.dot_dimension_numbers<[2], [1], [1], [2], [0, 0, 0, 1, 1, 2], [0], [0]>} : vector<1x8x8xf32>, vector<1x8x32xf32>, vector<1x8x32xf32> -> vector<1x8x32xf32>
    "tpu.trace_stop"() : () -> ()
    %c0_12 = arith.constant 0 : index
    %c0_13 = arith.constant 0 : index
    %c0_14 = arith.constant 0 : index
    %16 = vector.load %arg6[%c0_12, %c0_13, %c0_14] : memref<1x8x8xf32, #tpu.memory_space<vmem>>, vector<1x8x8xf32>
    tpu.vector_store %arg6[%c0_12, %c0_13, %c0_14], %14 {strides = array<i32>} : memref<1x8x8xf32, #tpu.memory_space<vmem>>, vector<1x8x8xf32>,
    %c0_15 = arith.constant 0 : index
    %c0_16 = arith.constant 0 : index
    %c0_17 = arith.constant 0 : index
    %17 = vector.load %arg5[%c0_15, %c0_16, %c0_17] : memref<1x8x32xf32, #tpu.memory_space<vmem>>, vector<1x8x32xf32>
    tpu.vector_store %arg5[%c0_15, %c0_16, %c0_17], %15 {strides = array<i32>} : memref<1x8x32xf32, #tpu.memory_space<vmem>>, vector<1x8x32xf32>,
    return
  }
  func.func @transform_0(%arg0: i32, %arg1: i32) -> (i32, i32, i32) {
    %c0_i32 = arith.constant 0 : i32
    %c0_i32_0 = arith.constant 0 : i32
    return %arg0, %arg1, %c0_i32 : i32, i32, i32
  }
  func.func @transform_1(%arg0: i32, %arg1: i32) -> (i32, i32, i32) {
    %c0_i32 = arith.constant 0 : i32
    %c0_i32_0 = arith.constant 0 : i32
    %c0_i32_1 = arith.constant 0 : i32
    return %arg0, %c0_i32, %c0_i32_0 : i32, i32, i32
  }
  func.func @transform_2(%arg0: i32, %arg1: i32) -> (i32, i32, i32) {
    %c0_i32 = arith.constant 0 : i32
    %c0_i32_0 = arith.constant 0 : i32
    %c0_i32_1 = arith.constant 0 : i32
    return %arg0, %c0_i32, %c0_i32_0 : i32, i32, i32
  }
  func.func @transform_3(%arg0: i32, %arg1: i32) -> (i32, i32, i32) {
    %c0_i32 = arith.constant 0 : i32
    %c0_i32_0 = arith.constant 0 : i32
    return %arg0, %arg1, %c0_i32 : i32, i32, i32
  }
  func.func @transform_4(%arg0: i32, %arg1: i32) -> (i32, i32, i32) {
    %c0_i32 = arith.constant 0 : i32
    %c0_i32_0 = arith.constant 0 : i32
    return %arg0, %arg1, %c0_i32 : i32, i32, i32
  }
}

</mosaic_0001>

<bundles_post_ra>
// kernel: tpu_custom_call.1
= control target key start
LH: loop header
LB: loop body
LE: loop exit
PB: predicated region body
PF: predicated region fallthrough
CT: control target
= control target key end

     0   :  { %s1264_s0 = inlined_call_operand.hbm [shape: f32[2,8,32], index: 0, kind: input, shape index: {}]   ;;  %s1265_s1 = inlined_call_operand.hbm [shape: f32[2,8,32], index: 1, kind: input, shape index: {}]   ;;  %s1266_s2 = inlined_call_operand.hbm [shape: f32[2,8,32], index: 2, kind: input, shape index: {}]   ;;  %s1267_s3 = inlined_call_operand.hbm [shape: f32[2,8,32], index: 3, kind: output, shape index: {0}]   ;;  %s1268_s4 = inlined_call_operand.hbm [shape: f32[2,8,8], index: 4, kind: output, shape index: {1}]  }
   0x1   :  { %1272 = sst [smem:[#allocation18_spill]] %s1265_s1 }
   0x2   :  { %10 = vsyncpa [#allocation3], 0 }
   0x3   :  { %12 = vsyncpa [#allocation3 + $0x1], 0 }
   0x4   :  { %13 = vsyncpa [#allocation6], 0 }
   0x5   :  { %15 = vsyncpa [#allocation6 + $0x1], 0 }
   0x6   :  { %16 = vsyncpa [#allocation4], 0 }
   0x7   :  { %18 = vsyncpa [#allocation4 + $0x1], 0 }
   0x8   :  { %19 = vsyncpa [#allocation10], 0 }
   0x9   :  { %21 = vsyncpa [#allocation10 + $0x1], 0  ;;  %s1026_s15 = smov 0   ;;  %s1028_s16 = smov 0  }
   0xa   :  { %s1030_s17 = smov 0   ;;  %s1032_s18 = smov 0  }
   0xb   :  { %s1034_s19 = smov 0   ;;  %s1036_s20 = smov 0  }
   0xc LB: > { %1273 = sst [smem:[#allocation15_spill]] %s988_s19  ;;  %s1057_s21 = sadd.s32 4294967295, %s992_s20   ;;  %s992_s20 = sphi %s1036_s20, %s27_s20   ;;  %s988_s19 = sphi %s1034_s19, %s1287_s19   ;;  %s984_s18 = sphi %s1032_s18, %s1286_s18   ;;  %s980_s17 = sphi %s1030_s17, %s1290_s17   ;;  %s976_s16 = sphi %s1028_s16, %s1289_s16   ;;  %s972_s15 = sphi %s1026_s15, %s1288_s15  }
   0xd   : > { %s673_s22 = sadd.s32 4294967294, %s992_s20   ;;  %s39_s23 = sadd.s32 1, %s988_s19 }
   0xe   : > { %s48_s24 = sadd.s32 1, %s980_s17  ;;  %p41_p0 = scmp.ge.s32.totalorder %s39_s23, 2 }
   0xf   : > { %p55_p1 = scmp.ne.s32.totalorder %s980_s17, %s976_s16  ;;  %p56_p2 = scmp.eq.s32.totalorder %s992_s20, 0 }
  0x10   : > { %p61_p3 = scmp.ne.s32.totalorder %s976_s16, %s972_s15  ;;  %s1292_s23 = smov (%p41_p0, %s39_s23), 0 }
  0x11   : > { %1274 = sst [smem:[#allocation16_spill]] %s1292_s23  ;;  %p1069_p4 = por %p56_p2, %p55_p1 }
  0x12   : > { %p62_p5 = scmp.eq.s32.totalorder %s1057_s21, 0  ;;  %s43_s26 = ssub.s32 %s988_s19, %s1292_s23 }
  0x13   : > { %p139_p6 = scmp.eq.s32.totalorder %s1057_s21, 1  ;;  %p46_p7 = scmp.eq.s32.totalorder %s43_s26, 0 }
  0x14   : > { %p1077_p8 = por %p62_p5, %p61_p3  ;;  %p145_p10 = scmp.eq.s32.totalorder %s673_s22, 1 }
  0x15   : > { %p1081_p9 = por %p139_p6, %p55_p1  ;;  %p738_p13 = scmp.lt.s32.totalorder %s992_s20, 2 }
  0x16   : > { %s1086_s29 = scalar_select %p46_p7, %s980_s17, %s48_s24  }
  0x17   : > { %p1088_p11 = por %p145_p10, %p61_p3  ;;  %s1269_s5 = sand.u32 1, %s980_s17  }
  0x18   : > { %1278 = sst [smem:[#allocation17_spill]] %s1086_s29  ;;  %s1097_s6 = sshll.u32 %s1269_s5, 3 }
  0x19   : > { %s1100_s7 = sshll.u32 %s988_s19, 7  ;;  %p1104_p0 = pnand %p738_p13, %p1069_p4 }
  0x1a   : > { %s212_s9 = sand.u32 1, %s992_s20   ;;  %s1281_s1 = sld [smem:[#allocation18_spill]] }
  0x1b   : > { %s216_s13 = scalar_lea.vmem [#allocation5], %s1097_s6  ;;  %p682_p1 = scmp.ge.s32.totalorder %s992_s20, 1 }
  0x1c   : > { %s223_s14 = sshll.u32 %s216_s13, 4  ;;  %p246_p2 = scmp.lt.s32.totalorder %s992_s20, 3  ;;  %s224_s14 = int_to_ptr.vmem [resolvable:$true] %s223_s14 }
  0x1d   : > { %s1116_s22 = scalar_lea.sflag [#allocation6], %s212_s9  ;;  %p796_p3 = pneg %p1104_p0 }
  0x1e   : > { %s807_s24 = scalar_lea.vmem %s224_s14, 128  ;;  %s994_s25 = smov [#allocation5]  }
  0x1f   : > { %p808_p4 = scmp.ne.s32.totalorder %s224_s14, %s807_s24  ;;  %s812_s26 = sshll.u32 %s994_s25, 4  ;;  %s813_s26 = int_to_ptr.vmem [resolvable:$false] %s812_s26 }
  0x20   : > { %s221_s12 = scalar_lea.hbm %s1281_s1, %s1100_s7  ;;  %s814_s10 = scalar_lea.vmem %s813_s26, 256 }
  0x21   : > { %p810_p5 = pnand %p808_p4, %p796_p3  ;;  %p815_p7 = scmp.lt.s32.totalorder %s224_s14, %s813_s26 }
  0x22   : > { %p816_p10 = scmp.lt.s32.totalorder %s814_s10, %s807_s24 }
  0x23   : > { %p811_p6 = pneg %p810_p5 }
  0x24   : > { %p817_p13 = por %p816_p10, %p815_p7 }
  0x26   : > { %p818_p12 = pnand %p817_p13, %p811_p6 }
  0x28   : > { %821 = shalt.err (!%p818_p12)
}
  0x29   : > { %727 = dma.hbm_to_vmem [thread:$0]  (!%p1104_p0), %s221_s12, 128, %s224_s14, %s1116_s22  }
  0x2a   : > { %p1130_p4 = pnand %p682_p1, %p246_p2  ;;  %s203_s24 = scalar_lea.hbm %s1264_s0, %s1100_s7 }
  0x2b   : > { %s197_s25 = scalar_lea.vmem [#allocation2], %s1097_s6  ;;  %s239_s1 = scalar_lea.hbm %s1266_s2, %s1100_s7 }
  0x2c   : > { %s205_s26 = sshll.u32 %s197_s25, 4  ;;  %s1283_s23 = sand.u32 1, %s980_s17   ;;  %s206_s26 = int_to_ptr.vmem [resolvable:$true] %s205_s26 }
  0x2d   : > { %s194_s19 = scalar_lea.sflag [#allocation3], %s1283_s23  ;;  %s835_s12 = scalar_lea.vmem %s206_s26, 128 }
  0x2e   : > { %p836_p12 = scmp.ne.s32.totalorder %s206_s26, %s835_s12  ;;  %s995_s14 = smov [#allocation2]  }
  0x2f   : > { %s840_s29 = sshll.u32 %s995_s14, 4  ;;  %s841_s29 = int_to_ptr.vmem [resolvable:$false] %s840_s29 }
  0x30   : > { %p838_p1 = pnand %p836_p12, %p796_p3  ;;  %s842_s11 = scalar_lea.vmem %s841_s29, 256 }
  0x31   : > { %p843_p5 = scmp.lt.s32.totalorder %s206_s26, %s841_s29  ;;  %p844_p6 = scmp.lt.s32.totalorder %s842_s11, %s835_s12 }
  0x32   : > { %p839_p2 = pneg %p838_p1 }
  0x33   : > { %p845_p7 = por %p844_p6, %p843_p5 }
  0x35   : > { %p846_p10 = pnand %p845_p7, %p839_p2 }
  0x37   : > { %849 = shalt.err (!%p846_p10)
}
  0x38   : > { %724 = dma.hbm_to_vmem [thread:$0]  (!%p1104_p0), %s203_s24, 128, %s206_s26, %s194_s19  }
  0x39   : > { %s234_s23 = scalar_lea.vmem [#allocation7], %s1097_s6  ;;  %s996_s25 = smov [#allocation7]  }
  0x3a   : > { %s241_s5 = sshll.u32 %s234_s23, 4  ;;  %s868_s29 = sshll.u32 %s996_s25, 4  ;;  %s242_s5 = int_to_ptr.vmem [resolvable:$true] %s241_s5  ;;  %s869_s29 = int_to_ptr.vmem [resolvable:$false] %s868_s29 }
  0x3b   : > { %s863_s13 = scalar_lea.vmem %s242_s5, 128  ;;  %s870_s10 = scalar_lea.vmem %s869_s29, 256 }
  0x3c   : > { %p864_p13 = scmp.ne.s32.totalorder %s242_s5, %s863_s13  ;;  %p871_p2 = scmp.lt.s32.totalorder %s242_s5, %s869_s29 }
  0x3d   : > { %p872_p5 = scmp.lt.s32.totalorder %s870_s10, %s863_s13 }
  0x3e   : > { %p866_p12 = pnand %p864_p13, %p796_p3 }
  0x3f   : > { %p873_p6 = por %p872_p5, %p871_p2 }
  0x40   : > { %p867_p1 = pneg %p866_p12 }
  0x42   : > { %p874_p7 = pnand %p873_p6, %p867_p1 }
  0x44   : > { %877 = shalt.err (!%p874_p7)
}
  0x45   : > { %730 = dma.hbm_to_vmem [thread:$0]  (!%p1104_p0), %s239_s1, 128, %s242_s5, %s1116_s22  }
  0x46   : > { %250 = sbr.rel (%p1130_p4) target bundleno = 797 (0x31d), region = 32  ;;  %s1165_s24 = sand.u32 (!%p1130_p4), 1, %s976_s16  }
  0x47   : > { %s1168_s26 = sshll.u32 (!%p1130_p4), %s1165_s24, 3  ;;  %s253_s8 = scalar_lea.sflag (!%p1130_p4), [#allocation3], %s1165_s24 }
  0x48   : > { %s256_s12 = scalar_lea.vmem (!%p1130_p4), [#allocation2], %s1168_s26 }
  0x4b   : > { %955 = dma.done.wait (%p1077_p8), %s253_s8, 128  }
  0x4c   : > { %957 = vsyncadd (%p1077_p8), %s253_s8, 4294967168  ;;  %s261_s1 = sand.u32 1, %s1057_s21   ;;  %s265_s22 = scalar_lea.vmem [#allocation5], %s1168_s26 }
  0x4d   : > { %s262_s7 = scalar_lea.sflag [#allocation6], %s261_s1 }
  0x4e   : > { %959 = dma.done.wait (%p1077_p8), %s262_s7, 256  }
  0x4f   : > { %961 = vsyncadd (%p1077_p8), %s262_s7, 4294967040  ;;  %v997_v0 = vmov 0.0   ;;  %vm998_vm0 = vmmov 0   ;;  %vm318_vm1 = vcmask 261120   ;;  %v316_v1 = vld [vmem:[%s265_s22] sm:$0xff]  ;;  %v314_v2 = vld [vmem:[%s256_s12] sm:$0xff] }
  0x50   : > { %701 = vmatprep.subr.mxu0 %v997_v0  ;;  %703 = vmatprep.mubr.msk.f32.mxu0 %vm998_vm0, %v997_v0  ;;  %v315_v3 = vmul.f32 0.17677669, %v314_v2  ;;  %vm395_vm2 = vcmask 64512   ;;  %s274_s21 = scalar_lea.vmem [#allocation7], %s1168_s26  ;;  %s313_s27 = scalar_lea.vmem [#allocation9], %s1168_s26 }
  0x51   : > { %706 = vmatprep.subr.mxu1 %v997_v0  ;;  %708 = vmatprep.mubr.msk.f32.mxu1 %vm998_vm0, %v997_v0  ;;  %v317_v12 = vld [vmem:[%s274_s21] sm:$0xff]  ;;  %s693_s9 = sshll.u32 %s984_s18, 7  ;;  %s516_s5 = sshll.u32 %s313_s27, 4  ;;  %s517_s5 = int_to_ptr.vmem [resolvable:$true] %s516_s5 }
  0x52   : > { %702 = vmatpush3.xpose.msk.msra.mxu0 %vm318_vm1, %v316_v1  ;;  %707 = vmatpush3.msra.mxu1 %v317_v12  ;;  %s514_s23 = scalar_lea.hbm %s1268_s4, %s693_s9  ;;  %s488_s13 = scalar_lea.sflag [#allocation10], %s1165_s24 }
  0x53   : > { %s878_s25 = scalar_lea.vmem %s517_s5, 128  ;;  %s999_s29 = smov [#allocation9]  }
  0x54   : > { %p879_p8 = scmp.ne.s32.totalorder %s517_s5, %s878_s25  ;;  %s882_s10 = sshll.u32 %s999_s29, 4  ;;  %s883_s10 = int_to_ptr.vmem [resolvable:$false] %s882_s10 }
  0x55   : > { %704 = vmatmul.mubr.msk.f32.vlgmr.msra.gmra.mxu0 %vm318_vm1, %v315_v3  ;;  %s884_s19 = scalar_lea.vmem %s883_s10, 256  ;;  %p885_p4 = scmp.lt.s32.totalorder %s517_s5, %s883_s10 }
  0x56   : > { %p880_p0 = pnand %p879_p8, %p1081_p9  ;;  %p886_p10 = scmp.lt.s32.totalorder %s884_s19, %s878_s25 }
  0x58   : > { %p881_p3 = pneg %p880_p0  ;;  %p887_p13 = por %p886_p10, %p885_p4 }
  0x5a   : > { %p888_p12 = pnand %p887_p13, %p881_p3 }
 0x115   : > { %v391_v4 = vpop.f32.mrf.mxu0 }
 0x116   : > { %v396_v5 = vsel %vm395_vm2, %v391_v4, -inf }
 0x117   : > { %397 = vmax.xlane.f32.xlu0 %v396_v5  ;;  %v705_v6 = vpop.f32.mrf.mxu0 }
 0x1a0   : > { %v398_v7 = vpop.xlane.xlu0 %397 }
 0x1a1   : > { %v399_v8 = vsub.f32 %v391_v4, %v398_v7 }
 0x1a3   : > { %v400_v9 = vmul.f32 1.442695, %v399_v8 }
 0x1a5   : > { %790 = vpow2.f32 %v400_v9 }
 0x1b2   : > { %v791_v10 = vpop.eup %790 }
 0x1b3   : > { %v402_v11 = vsel %vm395_vm2, %v791_v10, 0.0 }
 0x1b4   : > { %403 = vadd.xlane.f32.xlu0 %v402_v11 }
 0x23d   : > { %v404_v13 = vpop.xlane.xlu0 %403 }
 0x23e   : > { %792 = vrcp.f32 %v404_v13 }
 0x24b   : > { %v793_v14 = vpop.eup %792 }
 0x24c   : > { %v406_v15 = vmul.f32 %v793_v14, %v791_v10 }
 0x24e   : > { %709 = vmatmul.mubr.msk.f32.vlgmr.msra.gmra.mxu1 %vm395_vm2, %v406_v15  ;;  %480 = vst.msk [vmem:[%s313_s27] sm:$0xff] %vm395_vm2, %v406_v15 }
 0x24f   : > { %891 = shalt.err (!%p888_p12)
}
 0x250   : > { %s892_s6 = scalar_lea.hbm %s514_s23, 128  ;;  %s896_s1 = scalar_lea.hbm %s1268_s4, 256 }
 0x251   : > { %p893_p1 = scmp.ne.s32.totalorder %s514_s23, %s892_s6  ;;  %p897_p6 = scmp.lt.s32.totalorder %s514_s23, %s1268_s4 }
 0x252   : > { %p898_p7 = scmp.lt.s32.totalorder %s896_s1, %s892_s6 }
 0x253   : > { %p894_p2 = pnand %p893_p1, %p1081_p9 }
 0x254   : > { %p899_p8 = por %p898_p7, %p897_p6 }
 0x255   : > { %p895_p5 = pneg %p894_p2 }
 0x257   : > { %p900_p0 = pnand %p899_p8, %p895_p5 }
 0x259   : > { %903 = shalt.err (!%p900_p0)
}
 0x25a   : > { %718 = dma.vmem_to_hbm [thread:$0]  (%p1081_p9), %s517_s5, 128, %s514_s23, %s488_s13  }
 0x25b   : > { %s306_s21 = scalar_lea.vmem [#allocation8], %s1168_s26  ;;  %s1215_s25 = scalar_lea.hbm %s1267_s3, %s693_s9 }
 0x25c   : > { %s502_s27 = sshll.u32 %s306_s21, 4  ;;  %s483_s29 = scalar_lea.sflag [#allocation4], %s1165_s24  ;;  %s1217_s27 = int_to_ptr.vmem [resolvable:$true] %s502_s27 }
 0x25d   : > { %s904_s10 = scalar_lea.vmem %s1217_s27, 128  ;;  %s1000_s18 = smov [#allocation8]  }
 0x25e   : > { %p905_p3 = scmp.ne.s32.totalorder %s1217_s27, %s904_s10  ;;  %s908_s26 = sshll.u32 %s1000_s18, 4  ;;  %s909_s26 = int_to_ptr.vmem [resolvable:$false] %s908_s26 }
 0x25f   : > { %s910_s9 = scalar_lea.vmem %s909_s26, 256  ;;  %p911_p13 = scmp.lt.s32.totalorder %s1217_s27, %s909_s26 }
 0x260   : > { %p906_p4 = pnand %p905_p3, %p1081_p9  ;;  %p912_p12 = scmp.lt.s32.totalorder %s910_s9, %s904_s10 }
 0x262   : > { %p907_p10 = pneg %p906_p4  ;;  %p913_p1 = por %p912_p12, %p911_p13 }
 0x264   : > { %p914_p2 = pnand %p913_p1, %p907_p10 }
 0x30e   : > { %v476_v16 = vpop.f32.mrf.mxu1 }
 0x30f   : > { %481 = vst.msk [vmem:[%s306_s21] sm:$0xff] %vm318_vm1, %v476_v16 }
 0x310   : > { %v710_v17 = vpop.f32.mrf.mxu1 }
 0x311   : > { %917 = shalt.err (!%p914_p2)
}
 0x312   : > { %s918_s23 = scalar_lea.hbm %s1215_s25, 128  ;;  %s922_s13 = scalar_lea.hbm %s1267_s3, 256 }
 0x313   : > { %p919_p5 = scmp.ne.s32.totalorder %s1215_s25, %s918_s23  ;;  %p923_p8 = scmp.lt.s32.totalorder %s1215_s25, %s1267_s3 }
 0x314   : > { %p924_p0 = scmp.lt.s32.totalorder %s922_s13, %s918_s23 }
 0x315   : > { %p920_p6 = pnand %p919_p5, %p1081_p9 }
 0x316   : > { %p925_p3 = por %p924_p0, %p923_p8 }
 0x317   : > { %p921_p7 = pneg %p920_p6 }
 0x319   : > { %p926_p4 = pnand %p925_p3, %p921_p7 }
 0x31b   : > { %929 = shalt.err (!%p926_p4)
}
 0x31c   : > { %717 = dma.vmem_to_hbm [thread:$0]  (%p1081_p9), %s1217_s27, 128, %s1215_s25, %s483_s29  }
 0x31d PF: > { %s528_s8 = sand.u32 1, %s972_s15   ;;  %p1284_p10 = scmp.ge.s32.totalorder %s992_s20, 2 }
 0x31e   : > { %s529_s12 = scalar_lea.sflag [#allocation4], %s528_s8 }
 0x31f   : > { %p732_p13 = pnand %p1284_p10, %p1088_p11 }
 0x321   : > { %p733_p12 = pneg %p732_p13 }
 0x323   : > { %963 = dma.done.wait (%p733_p12), %s529_s12, 128  }
 0x324   : > { %965 = vsyncadd (%p733_p12), %s529_s12, 4294967168  ;;  %s538_s1 = scalar_lea.sflag [#allocation10], %s528_s8 }
 0x325   : > { %967 = dma.done.wait (%p733_p12), %s538_s1, 128  }
 0x326   : > { %969 = vsyncadd (%p733_p12), %s538_s1, 4294967168  ;;  %s27_s20 = sadd.s32 1, %s992_s20   ;;  %s1285_s28 = sld [smem:[#allocation17_spill]] }
 0x327   : > { %p24_p1 = scmp.ge.s32.totalorder %s27_s20, 4   ;;  %s1286_s18 = sld [smem:[#allocation15_spill]] }
 0x328   : > { %s1287_s19 = sld [smem:[#allocation16_spill]]  ;;  %s1288_s15 = smov %s976_s16 }
 0x329   : > { %s1289_s16 = smov %s980_s17  ;;  %26 = sbr.rel (!%p24_p1) target bundleno = 12 (0xc), region = 118 }
 0x32c   : > { %s1290_s17 = smov %s1285_s28 }
 0x32e   :  { %543 = vsyncpa [#allocation3], 1 }
 0x32f   :  { %545 = vsyncpa [#allocation3 + $0x1], 1 }
 0x330   :  { %546 = vsyncpa [#allocation6], 1 }
 0x331   :  { %548 = vsyncpa [#allocation6 + $0x1], 1 }
 0x332   :  { %549 = vsyncpa [#allocation4], 1 }
 0x333   :  { %551 = vsyncpa [#allocation4 + $0x1], 1 }
 0x334   :  { %552 = vsyncpa [#allocation10], 1 }
 0x335   :  { %554 = vsyncpa [#allocation10 + $0x1], 1 }

</bundles_post_ra>
